<compile_context>
chip_gen: v6e
topology: v6e:2x2x1
jax: 0.10.0
libtpu: 0.0.40
codegen_flags: <defaults>
</compile_context>

<pallas_src>
import jax
import jax.numpy as jnp
from jax.experimental import pallas as pl
from jax.experimental.pallas import tpu as pltpu

# TODO(synk): the original forward adds `x1 + x1` (shape (N,3,H,W)) to the
# 32-channel conv sum (N,32,Ho,Wo); that broadcast is invalid and the PyTorch
# module itself raises, so the computed semantics here are relu(7*conv(x)).
# TODO(synk): the im2col patch matrix is still materialized once by the wrapper
# (~2.25x input HBM traffic); a fully in-kernel fused im2col (manual DMA of
# input row slabs + strided VMEM gather) would remove that extra pass.


def _conv7_relu_kernel(p_ref, w_ref, b_ref, o_ref):
    # p_ref: (Kdim, TM)   im2col patch tile, output pixels on the lane axis
    # w_ref: (Cout, Kdim) weights pre-scaled by 7 (VMEM-resident across grid)
    # b_ref: (Cout, 1)    bias pre-scaled by 7   (VMEM-resident across grid)
    # o_ref: (Cout, TM)   output tile, already in final NC(H*W) layout
    acc = jnp.dot(w_ref[...], p_ref[...], preferred_element_type=jnp.float32)
    o_ref[...] = jnp.maximum(acc + b_ref[...], 0.0).astype(o_ref.dtype)


def model_forward(x_nchw, weight_oihw, bias, *, stride=2, ksize=3, tm_max=16384):
    """x_nchw: (N,Cin,H,W) f32; weight_oihw: (Cout,Cin,K,K); bias: (Cout,)."""
    N, Cin, H, W = x_nchw.shape
    Cout = weight_oihw.shape[0]
    K = ksize
    Ho = (H - K) // stride + 1
    Wo = (W - K) // stride + 1
    Mi = Ho * Wo                      # output pixels per image
    Kdim = K * K * Cin                # 27 -- kept unpadded (full-dim block)

    x = x_nchw.astype(jnp.float32)

    # im2col directly from NCHW into (N, Kdim, Mi): each (kh, kw) tap is a plain
    # strided slice + contiguous reshape -- no transposes anywhere.
    # Row order is (kh, kw, cin); the weight reshape below matches it.
    taps = []
    for kh in range(K):
        for kw in range(K):
            sl = x[:, :, kh: kh + stride * Ho: stride,
                         kw: kw + stride * Wo: stride]        # (N, Cin, Ho, Wo)
            taps.append(sl.reshape(N, Cin, Mi))
    patches = jnp.concatenate(taps, axis=1)                   # (N, Kdim, Mi)

    # Balanced, lane-aligned tile over Mi: no dead full tiles, >=2 tiles for big
    # images (feeds both TensorCores), single exact full-dim tile when small.
    n_tiles = -(-Mi // tm_max)
    if Mi >= 4096:
        n_tiles = max(n_tiles, 2)
    if n_tiles == 1:
        TM = Mi                                                # exact, no masking
    else:
        TM = ((-(-Mi // n_tiles) + 127) // 128) * 128          # lane-aligned
        n_tiles = -(-Mi // TM)

    # Fold the 7 identical conv branches and the bias into the parameters.
    w2d = (7.0 * jnp.transpose(weight_oihw, (0, 2, 3, 1)).reshape(Cout, Kdim)
           ).astype(jnp.float32)                               # rows: (kh,kw,cin)
    b2d = (7.0 * bias).reshape(Cout, 1).astype(jnp.float32)

    out = pl.pallas_call(
        _conv7_relu_kernel,
        out_shape=jax.ShapeDtypeStruct((N, Cout, Mi), jnp.float32),
        grid=(N, n_tiles),
        in_specs=[
            pl.BlockSpec((None, Kdim, TM), lambda n, i: (n, 0, i)),  # patches
            pl.BlockSpec((Cout, Kdim), lambda n, i: (0, 0)),         # weights
            pl.BlockSpec((Cout, 1), lambda n, i: (0, 0)),            # bias
        ],
        out_specs=pl.BlockSpec((None, Cout, TM), lambda n, i: (n, 0, i)),
        compiler_params=pltpu.CompilerParams(
            dimension_semantics=("parallel", "parallel"),
            vmem_limit_bytes=32 * 1024 * 1024,
        ),
    )(patches, w2d, b2d)

    # The kernel already wrote the final NCHW layout; this reshape is free.
    return out.reshape(N, Cout, Ho, Wo)


if __name__ == "__main__":
    # Small shapes consistent with the module: Conv2d(3, 32, 3, stride=2, pad=0)
    N, Cin, H, W = 2, 3, 16, 16
    Cout, K = 32, 3

    key = jax.random.PRNGKey(0)
    kx, kw_key, kb_key = jax.random.split(key, 3)
    x = jax.random.normal(kx, (N, Cin, H, W), dtype=jnp.float32)

    # Deterministic parameter init (PyTorch-style uniform(-bound, bound))
    fan_in = Cin * K * K
    bound = 1.0 / (fan_in ** 0.5)
    weight = jax.random.uniform(kw_key, (Cout, Cin, K, K), jnp.float32, -bound, bound)
    bias = jax.random.uniform(kb_key, (Cout,), jnp.float32, -bound, bound)

    out = model_forward(x, weight, bias)
    out = jax.block_until_ready(out)
    Ho = (H - K) // 2 + 1
    Wo = (W - K) // 2 + 1
    assert out.shape == (N, Cout, Ho, Wo), out.shape

    # Pure-JAX reference: relu(7 * (conv(x) + b))
    ref = jax.lax.conv_general_dilated(
        x, weight, window_strides=(2, 2), padding="VALID",
        dimension_numbers=("NCHW", "OIHW", "NCHW"))
    ref = jnp.maximum(7.0 * (ref + bias.reshape(1, Cout, 1, 1)), 0.0)
    assert jnp.allclose(out, ref, atol=1e-3, rtol=1e-3), (
        "mismatch vs reference, max abs err = %f"
        % float(jnp.max(jnp.abs(out - ref))))

    print("KERNEL_OK")
</pallas_src>

<mosaic_0001>
module attributes {stable_mosaic.version = 11 : i64} {
  func.func @_conv7_relu_kernel(%arg0: i32, %arg1: i32, %arg2: memref<1x27x49xf32, #tpu.memory_space<vmem>>, %arg3: memref<32x27xf32, #tpu.memory_space<vmem>>, %arg4: memref<32x1xf32, #tpu.memory_space<vmem>>, %arg5: memref<1x32x49xf32, #tpu.memory_space<vmem>>) attributes {dimension_semantics = [#tpu.dimension_semantics<parallel>, #tpu.dimension_semantics<parallel>], iteration_bounds = array<i64: 2, 1>, scalar_prefetch = 0 : i64, scratch_operands = 0 : i64, tpu.core_type = #tpu.core_type<tc>, window_params = [{transform_indices = @transform_0, window_bounds = array<i64: 1, 27, 49>}, {pipeline_mode = #tpu.pipeline_mode<synchronous>, transform_indices = @transform_1, window_bounds = array<i64: 32, 27>}, {pipeline_mode = #tpu.pipeline_mode<synchronous>, transform_indices = @transform_2, window_bounds = array<i64: 32, 1>}, {transform_indices = @transform_3, window_bounds = array<i64: 1, 32, 49>}]} {
    %c0 = arith.constant 0 : index
    %c0_0 = arith.constant 0 : index
    %0 = vector.load %arg3[%c0, %c0_0] : memref<32x27xf32, #tpu.memory_space<vmem>>, vector<32x27xf32>
    %c0_1 = arith.constant 0 : index
    %c0_2 = arith.constant 0 : index
    %c0_3 = arith.constant 0 : index
    %1 = vector.load %arg2[%c0_1, %c0_2, %c0_3] : memref<1x27x49xf32, #tpu.memory_space<vmem>>, vector<1x27x49xf32>
    %2 = vector.shape_cast %1 : vector<1x27x49xf32> to vector<27x49xf32>
    %cst = arith.constant dense<0.000000e+00> : vector<32x49xf32>
    %3 = tpu.matmul %0, %2, %cst {dimension_numbers = #tpu.dot_dimension_numbers<[1], [0], [0], [1], [0, 0, 1, 1], [], []>} : vector<32x27xf32>, vector<27x49xf32>, vector<32x49xf32> -> vector<32x49xf32>
    %c0_4 = arith.constant 0 : index
    %c0_5 = arith.constant 0 : index
    %4 = vector.load %arg4[%c0_4, %c0_5] : memref<32x1xf32, #tpu.memory_space<vmem>>, vector<32x1xf32>
    %5 = vector.broadcast %4 : vector<32x1xf32> to vector<32x49xf32>
    %6 = arith.addf %3, %5 : vector<32x49xf32>
    %cst_6 = arith.constant 0.000000e+00 : f32
    %7 = vector.broadcast %cst_6 : f32 to vector<32x49xf32>
    %8 = arith.maximumf %6, %7 : vector<32x49xf32>
    %c0_7 = arith.constant 0 : index
    %c0_8 = arith.constant 0 : index
    %c0_9 = arith.constant 0 : index
    %9 = vector.load %arg5[%c0_7, %c0_8, %c0_9] : memref<1x32x49xf32, #tpu.memory_space<vmem>>, vector<1x32x49xf32>
    %10 = vector.shape_cast %9 : vector<1x32x49xf32> to vector<32x49xf32>
    %11 = vector.shape_cast %8 : vector<32x49xf32> to vector<1x32x49xf32>
    tpu.vector_store %arg5[%c0_7, %c0_8, %c0_9], %11 {strides = array<i32>} : memref<1x32x49xf32, #tpu.memory_space<vmem>>, vector<1x32x49xf32>,
    return
  }
  func.func @transform_0(%arg0: i32, %arg1: i32) -> (i32, i32, i32) {
    %c0_i32 = arith.constant 0 : i32
    %c0_i32_0 = arith.constant 0 : i32
    return %arg0, %c0_i32, %arg1 : i32, i32, i32
  }
  func.func @transform_1(%arg0: i32, %arg1: i32) -> (i32, i32) {
    %c0_i32 = arith.constant 0 : i32
    %c0_i32_0 = arith.constant 0 : i32
    %c0_i32_1 = arith.constant 0 : i32
    return %c0_i32, %c0_i32_0 : i32, i32
  }
  func.func @transform_2(%arg0: i32, %arg1: i32) -> (i32, i32) {
    %c0_i32 = arith.constant 0 : i32
    %c0_i32_0 = arith.constant 0 : i32
    %c0_i32_1 = arith.constant 0 : i32
    return %c0_i32, %c0_i32_0 : i32, i32
  }
  func.func @transform_3(%arg0: i32, %arg1: i32) -> (i32, i32, i32) {
    %c0_i32 = arith.constant 0 : i32
    %c0_i32_0 = arith.constant 0 : i32
    return %arg0, %c0_i32, %arg1 : i32, i32, i32
  }
}

</mosaic_0001>

<bundles_post_ra>
// kernel: tpu_custom_call.1
= control target key start
LH: loop header
LB: loop body
LE: loop exit
PB: predicated region body
PF: predicated region fallthrough
CT: control target
= control target key end

     0   :  { %8 = vsyncpa [#allocation3], 0  ;;  %s784_s0 = inlined_call_operand.vmem [shape: f32[2,27,49], index: 0, kind: input, shape index: {}]   ;;  %s785_s1 = inlined_call_operand.vmem [shape: f32[32,27], index: 1, kind: input, shape index: {}]   ;;  %s786_s2 = inlined_call_operand.vmem [shape: f32[32,1], index: 2, kind: input, shape index: {}]   ;;  %s787_s3 = inlined_call_operand.hbm [shape: f32[2,32,49], index: 3, kind: output, shape index: {}]  }
   0x1   :  { %10 = vsyncpa [#allocation3 + $0x1], 0  ;;  %s642_s12 = smov 0   ;;  %s644_s13 = smov 0  }
   0x2   :  { %s646_s14 = smov 0   ;;  %s648_s15 = smov 0  }
   0x3   :  { %s650_s16 = smov 0   ;;  %s652_s17 = smov 0  }
   0x4 LB: > { %s430_s18 = sadd.s32 4294967295, %s616_s17   ;;  %s431_s19 = sadd.s32 4294967294, %s616_s17   ;;  %s616_s17 = sphi %s652_s17, %s16_s17   ;;  %s612_s16 = sphi %s650_s16, %s794_s16   ;;  %s608_s15 = sphi %s648_s15, %s793_s15   ;;  %s604_s14 = sphi %s646_s14, %s792_s14   ;;  %s600_s13 = sphi %s644_s13, %s791_s13   ;;  %s596_s12 = sphi %s642_s12, %s790_s12  }
   0x5   : > { %s28_s20 = sadd.s32 1, %s612_s16  ;;  %s107_s21 = sadd.s32 1, %s604_s14 }
   0x6   : > { %p30_p0 = scmp.ge.s32.totalorder %s28_s20, 2  ;;  %p117_p1 = scmp.ne.s32.totalorder %s604_s14, %s600_s13 }
   0x7   : > { %p118_p2 = scmp.eq.s32.totalorder %s430_s18, 1  ;;  %p123_p3 = scmp.ne.s32.totalorder %s600_s13, %s596_s12 }
   0x8   : > { %s796_s20 = smov (%p30_p0, %s28_s20), 0  ;;  %p124_p5 = scmp.eq.s32.totalorder %s431_s19, 1 }
   0x9   : > { %p682_p4 = por %p118_p2, %p117_p1  ;;  %s102_s23 = ssub.s32 %s612_s16, %s796_s20 }
   0xa   : > { %p434_p6 = scmp.ge.s32.totalorder %s616_s17, 1  ;;  %p105_p7 = scmp.eq.s32.totalorder %s102_s23, 0 }
   0xb   : > { %p689_p8 = por %p124_p5, %p123_p3  ;;  %p159_p9 = scmp.lt.s32.totalorder %s616_s17, 3 }
   0xc   : > { %s695_s25 = scalar_select %p105_p7, %s604_s14, %s107_s21  }
   0xd   : > { %p160_p10 = pnand %p434_p6, %p159_p9 }
   0xe   : > { %p186_p11 = scmp.lt.s32.totalorder (!%p160_p10), %s608_s15, 1  ;;  %s183_s30 = sand.u32 (!%p160_p10), 1, %s600_s13  }
   0xf   : > { %163 = sbr.rel (%p160_p10) target bundleno = 246 (0xf6), region = 32  ;;  %s435_s4 = sshll.u32 (!%p160_p10), %s183_s30, 5 }
  0x10   : > { %s185_s5 = scalar_lea.vmem (!%p160_p10), [#allocation2], %s435_s4  ;;  %s619_s18 = smov (!%p160_p10), [#allocation2]  }
  0x11   : > { %s352_s6 = sshll.u32 (!%p160_p10), %s185_s5, 4  ;;  %s544_s19 = sshll.u32 (!%p160_p10), %s619_s18, 4  ;;  %s732_s6 = int_to_ptr.vmem [resolvable:$true] %s352_s6  ;;  %s545_s19 = int_to_ptr.vmem [resolvable:$false] %s544_s19 }
  0x12   : > { %s546_s21 = scalar_lea.vmem (!%p160_p10), %s545_s19, 1024  ;;  %p547_p1 = scmp.lt.s32.totalorder (!%p160_p10), %s732_s6, %s545_s19 }
  0x14   : > { %v194_v0 = vld [vmem:[%s785_s1] sm:$0xff]  ;;  %vm226_vm0 = vcmask 220160   ;;  %v196_v1 = vld [vmem:[%s785_s1 + $0x10] sm:$0xff]  ;;  %s187_s7 = scalar_select %p186_p11, %s608_s15, 1  ;;  %v618_v4 = vmov 0   ;;  %vm239_vm1 = vcmask 1042432  }
  0x15   : > { %466 = vmatprep.mubr.msk.f32.mxu0 %vm226_vm0, %v194_v0  ;;  %469 = vmatprep.mubr.msk.f32.mxu1 %vm226_vm0, %v196_v1  ;;  %v204_v2 = vld [vmem:[%s786_s2 + $0x10] sm:$0xff]  ;;  %v202_v3 = vld [vmem:[%s786_s2] sm:$0xff]  ;;  %v195_v9 = vld [vmem:[%s785_s1 + $0x8] sm:$0xff]  ;;  %vm332_vm2 = vcmask 400384  }
  0x16   : > { %539 = vset.pattern.permute.xlu1 %v618_v4  ;;  %538 = vset.pattern.permute.xlu0 %v618_v4  ;;  %s448_s8 = sshll.u32 %s187_s7, 5  ;;  %v197_v10 = vld [vmem:[%s785_s1 + $0x18] sm:$0xff]  ;;  %v203_v12 = vld [vmem:[%s786_s2 + $0x8] sm:$0xff]  ;;  %s449_s7 = sshll.u32 %s608_s15, 9 }
  0x17   : > { %218 = vperm.xlu1 %539, %v204_v2   ;;  %208 = vperm.xlu0 %538, %v202_v3   ;;  %s193_s11 = scalar_lea.vmem %s784_s0, %s448_s8  ;;  %v205_v11 = vld [vmem:[%s786_s2 + $0x18] sm:$0xff]  ;;  %s737_s10 = scalar_lea.hbm %s787_s3, %s449_s7 }
  0x18   : > { %v201_v5 = vld [vmem:[%s193_s11 + $0x18] sm:$0x7]  ;;  %v200_v6 = vld [vmem:[%s193_s11 + $0x10] sm:$0xff]  ;;  %v199_v7 = vld [vmem:[%s193_s11 + $0x8] sm:$0xff]  ;;  %s739_s15 = scalar_lea.sflag [#allocation3], %s183_s30 }
  0x19   : > { %458 = vmatprep.subr.msk.mxu0 %vm239_vm1, %v201_v5  ;;  %472 = vmatprep.subr.msk.mxu1 %vm239_vm1, %v201_v5  ;;  %v198_v8 = vld [vmem:[%s193_s11] sm:$0xff]  ;;  %s540_s11 = scalar_lea.vmem %s732_s6, 512 }
  0x1a   : > { %459 = vmatpush3.msk.msra.mxu0 %vm239_vm1, %v201_v5  ;;  %476 = vmatpush3.msk.msra.mxu1 %vm239_vm1, %v201_v5  ;;  %p541_p12 = scmp.ne.s32.totalorder %s732_s6, %s540_s11  ;;  %p548_p2 = scmp.lt.s32.totalorder %s546_s21, %s540_s11 }
  0x1b   : > { %460 = vmatprep.subr.mxu0 %v200_v6  ;;  %473 = vmatprep.subr.mxu1 %v200_v6 }
  0x1c   : > { %461 = vmatpush3.msra.mxu0 %v200_v6  ;;  %477 = vmatpush3.msra.mxu1 %v200_v6  ;;  %p542_p13 = pnand %p541_p12, %p682_p4  ;;  %p549_p3 = por %p548_p2, %p547_p1 }
  0x1d   : > { %462 = vmatprep.subr.mxu0 %v199_v7  ;;  %474 = vmatprep.subr.mxu1 %v199_v7 }
  0x1e   : > { %463 = vmatpush3.msra.mxu0 %v199_v7  ;;  %478 = vmatpush3.msra.mxu1 %v199_v7  ;;  %p543_p0 = pneg %p542_p13 }
  0x1f   : > { %464 = vmatprep.subr.mxu0 %v198_v8  ;;  %475 = vmatprep.subr.mxu1 %v198_v8 }
  0x20   : > { %465 = vmatpush3.msra.mxu0 %v198_v8  ;;  %479 = vmatpush3.msra.mxu1 %v198_v8  ;;  %p550_p5 = pnand %p549_p3, %p543_p0 }
  0x21   : > { %467 = vmatmul.mubr.msk.f32.vlgmr.msra.gmra.mxu0 %vm226_vm0, %v195_v9  ;;  %470 = vmatmul.mubr.msk.f32.vlgmr.msra.gmra.mxu1 %vm226_vm0, %v197_v10 }
  0x22   : > { %223 = vperm.xlu1 %539, %v205_v11   ;;  %213 = vperm.xlu0 %538, %v203_v12  }
  0x92   : > { %v219_v13 = vpop.permute.xlu1 %218  ;;  %v209_v14 = vpop.permute.xlu0 %208 }
  0x9d   : > { %v224_v15 = vpop.permute.xlu1 %223  ;;  %v214_v16 = vpop.permute.xlu0 %213 }
  0xe1   : > { %v468_v17 = vpop.f32.mrf.mxu0  ;;  %v471_v18 = vpop.f32.mrf.mxu1 }
  0xe2   : > { %v315_v19 = vadd.f32 %v468_v17, %v214_v16  ;;  %v325_v20 = vadd.f32 %v471_v18, %v224_v15 }
  0xe3   : > { %v309_v21 = vpop.f32.mrf.mxu0  ;;  %v319_v22 = vpop.f32.mrf.mxu1 }
  0xe4   : > { %v329_v23 = vmax.f32 %v315_v19, 0.0  ;;  %v331_v24 = vmax.f32 %v325_v20, 0.0  ;;  %v310_v25 = vadd.f32 %v309_v21, %v209_v14  ;;  %v320_v26 = vadd.f32 %v319_v22, %v219_v13 }
  0xe6   : > { %334 = vst.msk [vmem:[%s185_s5 + $0x8] sm:$0xff] %vm332_vm2, %v329_v23  ;;  %336 = vst.msk [vmem:[%s185_s5 + $0x18] sm:$0xff] %vm332_vm2, %v331_v24  ;;  %v328_v27 = vmax.f32 %v310_v25, 0.0  ;;  %v330_v28 = vmax.f32 %v320_v26, 0.0 }
  0xe8   : > { %333 = vst.msk [vmem:[%s185_s5] sm:$0xff] %vm332_vm2, %v328_v27  ;;  %335 = vst.msk [vmem:[%s185_s5 + $0x10] sm:$0xff] %vm332_vm2, %v330_v28 }
  0xe9   : > { %553 = shalt.err (!%p550_p5)
}
  0xea   : > { %s554_s23 = scalar_lea.hbm %s737_s10, 512  ;;  %s558_s28 = scalar_lea.hbm %s787_s3, 1024 }
  0xeb   : > { %p555_p6 = scmp.ne.s32.totalorder %s737_s10, %s554_s23  ;;  %p559_p10 = scmp.lt.s32.totalorder %s737_s10, %s787_s3 }
  0xec   : > { %p560_p11 = scmp.lt.s32.totalorder %s558_s28, %s554_s23 }
  0xed   : > { %p556_p7 = pnand %p555_p6, %p682_p4 }
  0xee   : > { %p561_p12 = por %p560_p11, %p559_p10 }
  0xef   : > { %p557_p9 = pneg %p556_p7 }
  0xf1   : > { %p562_p13 = pnand %p561_p12, %p557_p9 }
  0xf3   : > { %565 = shalt.err (!%p562_p13)
}
  0xf4   : > { %s620_s4 = smov 128   ;;  %s621_s5 = smov 8  }
  0xf5   : > { %480 = dma.vmem_to_hbm [thread:$0]  (%p682_p4), %s732_s6, 512, %s737_s10, %s739_s15, %s620_s4, %s620_s4, %s621_s5  }
  0xf6 PF: > { %p486_p0 = scmp.ge.s32.totalorder %s616_s17, 2  ;;  %s367_s7 = sand.u32 1, %s596_s12  }
  0xf7   : > { %s368_s8 = scalar_lea.sflag [#allocation3], %s367_s7 }
  0xf8   : > { %p483_p1 = pnand %p486_p0, %p689_p8 }
  0xfa   : > { %p484_p2 = pneg %p483_p1 }
  0xfc   : > { %591 = dma.done.wait (%p484_p2), %s368_s8, 512  }
  0xfd   : > { %593 = vsyncadd (%p484_p2), %s368_s8, 4294966784  ;;  %s16_s17 = sadd.s32 1, %s616_s17   ;;  %s790_s12 = smov %s600_s13 }
  0xfe   : > { %p13_p3 = scmp.ge.s32.totalorder %s16_s17, 4   ;;  %s791_s13 = smov %s604_s14 }
  0xff   : > { %s792_s14 = smov %s695_s25  ;;  %s793_s15 = smov %s612_s16 }
 0x100   : > { %s794_s16 = smov %s796_s20  ;;  %15 = sbr.rel (!%p13_p3) target bundleno = 4 (0x4), region = 67 }
 0x105   :  { %373 = vsyncpa [#allocation3], 1 }
 0x106   :  { %375 = vsyncpa [#allocation3 + $0x1], 1 }

</bundles_post_ra>
